<compile_context>
chip_gen: v7x
topology: tpu7x:2x2x1
jax: 0.10.0
libtpu: 0.0.40
codegen_flags: <defaults>
</compile_context>

<pallas_src>
import jax
import jax.numpy as jnp
import numpy as np
from jax.experimental import pallas as pl
from jax.experimental.pallas import tpu as pltpu


def _round_up(x, m):
    return ((x + m - 1) // m) * m


def _cdiv(a, b):
    return -(-a // b)


def _disc_kernel(obs_ref, act_ref,
                 ws1t_ref, bs1_ref, ws2t_ref, bs2_ref,
                 wcat_ref, wf2_ref, bf2_ref,
                 out_ref):
    """One batch tile of the Discriminator forward (feature-major layout).

    obs_ref  : (state_dim, TB) mxu-dtype   observations, batch along lanes
    act_ref  : (1, TB)         int32       discrete action ids
    ws1t/ws2t: state_feature weights, transposed to (out, in); bs1/bs2: (H, 1) f32
    wcat_ref : (H, A_PAD + H)  stacked fc1 weight^T = [atab ; Wf1[H:]]^T,
               where atab = tanh(tanh(Wa1+ba1)@Wa2+ba2) @ Wf1[:H] + bf1
               (action MLP + bf1 folded; rows action_dim..A_PAD are zero)
    wf2_ref  : (1, H)  final Linear weight^T
    bf2_ref  : (1, 1)  final Linear bias (f32)
    out_ref  : (1, TB) sigmoid probabilities, lane-dense (batch along lanes)
    """
    cdt = ws1t_ref.dtype                       # MXU operand dtype (bf16 default)
    tb = obs_ref.shape[1]
    h_dim = ws2t_ref.shape[0]
    a_pad = wcat_ref.shape[1] - h_dim          # padded one-hot row count

    obs = obs_ref[...]                         # (S, TB), already mxu dtype
    act = act_ref[...]                         # (1, TB) int32

    # ---- state_feature branch: two Linear+Tanh layers, all (H, TB) ----------
    s = jnp.tanh(jnp.dot(ws1t_ref[...], obs,
                         preferred_element_type=jnp.float32) + bs1_ref[...])
    s = jnp.tanh(jnp.dot(ws2t_ref[...], s.astype(cdt),
                         preferred_element_type=jnp.float32) + bs2_ref[...])

    # ---- action branch: ids -> one-hot along sublanes (A_PAD, TB) -----------
    # (torch .scatter_(1, actions, 1); padded rows never match a valid id)
    sub = jax.lax.broadcasted_iota(jnp.int32, (a_pad, tb), 0)
    onehot = (sub == act).astype(cdt)

    # ---- fc layer 1, fused: tanh([onehot ; s]^T-major @ [atab ; Wf1[H:]]) ----
    # bf1 is folded into atab, so no extra bias term here.
    hcat = jnp.concatenate([onehot, s.astype(cdt)], axis=0)   # (A_PAD+H, TB)
    h = jnp.tanh(jnp.dot(wcat_ref[...], hcat,
                         preferred_element_type=jnp.float32))  # (H, TB)

    # ---- fc layer 2 (out_features = 1): lane-dense (1, TB) row directly -----
    logit = jnp.dot(wf2_ref[...], h.astype(cdt),
                    preferred_element_type=jnp.float32) + bf2_ref[...]
    out_ref[...] = jax.nn.sigmoid(logit)


def discriminator_forward(obs, actions, params, *,
                          batch_tile=8192, mxu_dtype=jnp.bfloat16):
    """obs: (B, state_dim) f32 ; actions: (B,) int32 discrete action ids.

    batch_tile : upper bound on rows per grid step (rounded to multiples of 128).
    mxu_dtype  : matmul operand dtype (bf16 default — MXU-native on v5e/v6e/v7x;
                 biases / tanh / sigmoid / accumulation always stay f32).
    """
    obs = obs.astype(jnp.float32)
    B, state_dim = obs.shape
    H = params["ws1"].shape[1]
    action_dim = params["wa1"].shape[0]
    cdt = mxu_dtype

    # ---- tile selection: as few, as big, lane-aligned tiles as possible, but
    #      keep >= 2 parallel grid steps for B >= 1024 so both v7x TensorCores
    #      get work (cheap on single-TC v5e/v6e).
    tile_cap = max(128, _round_up(int(batch_tile), 128))
    n_tiles = max(_cdiv(B, tile_cap), 2 if B >= 1024 else 1)
    bt = min(tile_cap, max(128, _round_up(_cdiv(B, n_tiles), 128)))
    Bp = _round_up(B, bt)
    grid = (Bp // bt,)

    # ---- batch-major -> feature-major (batch along lanes), pad batch to Bp --
    act_row = actions.astype(jnp.int32).reshape(1, B)
    if Bp != B:
        obs = jnp.pad(obs, ((0, Bp - B), (0, 0)))
        act_row = jnp.pad(act_row, ((0, 0), (0, Bp - B)))   # pad id 0 is benign
    obs_t = obs.T.astype(cdt)                 # (state_dim, Bp); transpose+cast fuse

    # ---- algebraic precompute (discrete actions): the action MLP, its fc-1
    #      contribution and bf1 collapse into an (action_dim, H) table, which
    #      is stacked with the state half of Wf1 so fc1 is a single matmul.
    a_pad = _round_up(max(action_dim, 1), 16)           # sublane-aligned (bf16 & f32)
    atab = jnp.tanh(params["wa1"] + params["ba1"])      # eye @ Wa1 == Wa1
    atab = jnp.tanh(atab @ params["wa2"] + params["ba2"])
    atab = atab @ params["wf1"][:H] + params["bf1"]     # (action_dim, H)
    atab_pad = jnp.zeros((a_pad, H), jnp.float32).at[:action_dim].set(atab)
    wcat_t = jnp.concatenate([atab_pad, params["wf1"][H:]], axis=0).T.astype(cdt)

    weights = [
        params["ws1"].T.astype(cdt), params["bs1"].T.astype(jnp.float32),
        params["ws2"].T.astype(cdt), params["bs2"].T.astype(jnp.float32),
        wcat_t,                                          # (H, a_pad + H)
        params["wf2"].T.astype(cdt),                     # (1, H)
        params["bf2"].astype(jnp.float32),               # (1, 1)
    ]

    obs_spec = pl.BlockSpec((state_dim, bt), lambda i: (0, i))
    act_spec = pl.BlockSpec((1, bt), lambda i: (0, i))
    # Weights/biases are whole-array blocks with a constant index_map, so they
    # are fetched once and kept resident across grid steps.
    w_specs = [pl.BlockSpec(w.shape, lambda i: (0, 0)) for w in weights]

    out_row = pl.pallas_call(
        _disc_kernel,
        out_shape=jax.ShapeDtypeStruct((1, Bp), jnp.float32),
        grid_spec=pltpu.PrefetchScalarGridSpec(
            num_scalar_prefetch=0,
            grid=grid,
            in_specs=[obs_spec, act_spec] + w_specs,
            out_specs=pl.BlockSpec((1, bt), lambda i: (0, i)),
        ),
        compiler_params=pltpu.CompilerParams(
            dimension_semantics=("parallel",)),      # megacore-shardable on v7x
    )(obs_t, act_row, *weights)

    return out_row[0, :B].reshape(B, 1)


def _init_params(key, state_dim, action_dim, n_latent_var):
    """Deterministic synthetic init. Weights stored as (in, out); biases (1, out)."""
    H = n_latent_var
    shapes = {
        "ws1": (state_dim, H), "bs1": (1, H),
        "ws2": (H, H),         "bs2": (1, H),
        "wa1": (action_dim, H), "ba1": (1, H),
        "wa2": (H, H),          "ba2": (1, H),
        "wf1": (2 * H, H),      "bf1": (1, H),
        "wf2": (H, 1),          "bf2": (1, 1),
    }
    params = {}
    for name, shp in sorted(shapes.items()):
        key, sub = jax.random.split(key)
        params[name] = (0.1 * jax.random.normal(sub, shp)).astype(jnp.float32)
    return params


def _reference_forward(obs, actions, params):
    """Pure-JAX reference mirroring the PyTorch module."""
    action_dim = params["wa1"].shape[0]
    onehot = jax.nn.one_hot(actions, action_dim, dtype=jnp.float32)
    a = jnp.tanh(onehot @ params["wa1"] + params["ba1"])
    a = jnp.tanh(a @ params["wa2"] + params["ba2"])
    s = jnp.tanh(obs @ params["ws1"] + params["bs1"])
    s = jnp.tanh(s @ params["ws2"] + params["bs2"])
    h = jnp.concatenate([a, s], axis=1)
    h = jnp.tanh(h @ params["wf1"] + params["bf1"])
    return jax.nn.sigmoid(h @ params["wf2"] + params["bf2"])


if __name__ == "__main__":
    # shapes implied by the module: state_dim=16, action_dim=4 (discrete),
    # n_latent_var=32
    STATE_DIM, ACTION_DIM, N_LATENT = 16, 4, 32

    key = jax.random.PRNGKey(0)
    k_params, k_obs, k_act = jax.random.split(key, 3)
    params = _init_params(k_params, STATE_DIM, ACTION_DIM, N_LATENT)

    # --- small single-tile run with f32 MXU operands, tight numerical check --
    B1 = 16
    obs1 = jax.random.normal(k_obs, (B1, STATE_DIM), dtype=jnp.float32)
    act1 = jax.random.randint(k_act, (B1,), 0, ACTION_DIM, dtype=jnp.int32)
    out1 = jax.block_until_ready(
        discriminator_forward(obs1, act1, params, mxu_dtype=jnp.float32))
    ref1 = jax.block_until_ready(_reference_forward(obs1, act1, params))
    assert out1.shape == (B1, 1)
    np.testing.assert_allclose(np.asarray(out1), np.asarray(ref1),
                               rtol=2e-5, atol=2e-5)

    # --- medium batch, default bf16 MXU operands, padded single tile ---------
    B2 = 300
    k_obs2, k_act2 = jax.random.split(jax.random.PRNGKey(1))
    obs2 = jax.random.normal(k_obs2, (B2, STATE_DIM), dtype=jnp.float32)
    act2 = jax.random.randint(k_act2, (B2,), 0, ACTION_DIM, dtype=jnp.int32)
    out2 = jax.block_until_ready(discriminator_forward(obs2, act2, params))
    ref2 = jax.block_until_ready(_reference_forward(obs2, act2, params))
    assert out2.shape == (B2, 1)
    np.testing.assert_allclose(np.asarray(out2), np.asarray(ref2),
                               rtol=0.0, atol=2e-2)

    # --- larger batch: >= 2 parallel grid steps (v7x megacore) + padding -----
    B3 = 2125
    k_obs3, k_act3 = jax.random.split(jax.random.PRNGKey(2))
    obs3 = jax.random.normal(k_obs3, (B3, STATE_DIM), dtype=jnp.float32)
    act3 = jax.random.randint(k_act3, (B3,), 0, ACTION_DIM, dtype=jnp.int32)
    out3 = jax.block_until_ready(discriminator_forward(obs3, act3, params))
    ref3 = jax.block_until_ready(_reference_forward(obs3, act3, params))
    assert out3.shape == (B3, 1)
    np.testing.assert_allclose(np.asarray(out3), np.asarray(ref3),
                               rtol=0.0, atol=2e-2)

    print("KERNEL_OK")
</pallas_src>

<mosaic_0001>
module attributes {stable_mosaic.version = 11 : i64} {
  func.func @_disc_kernel(%arg0: i32, %arg1: memref<16x128xf32, #tpu.memory_space<vmem>>, %arg2: memref<1x128xi32, #tpu.memory_space<vmem>>, %arg3: memref<32x16xf32, #tpu.memory_space<vmem>>, %arg4: memref<32x1xf32, #tpu.memory_space<vmem>>, %arg5: memref<32x32xf32, #tpu.memory_space<vmem>>, %arg6: memref<32x1xf32, #tpu.memory_space<vmem>>, %arg7: memref<32x48xf32, #tpu.memory_space<vmem>>, %arg8: memref<1x32xf32, #tpu.memory_space<vmem>>, %arg9: memref<1x1xf32, #tpu.memory_space<vmem>>, %arg10: memref<1x128xf32, #tpu.memory_space<vmem>>) attributes {dimension_semantics = [#tpu.dimension_semantics<parallel>], iteration_bounds = array<i64: 1>, scalar_prefetch = 0 : i64, scratch_operands = 0 : i64, tpu.core_type = #tpu.core_type<tc>, window_params = [{transform_indices = @transform_0, window_bounds = array<i64: 16, 128>}, {transform_indices = @transform_1, window_bounds = array<i64: 1, 128>}, {pipeline_mode = #tpu.pipeline_mode<synchronous>, transform_indices = @transform_2, window_bounds = array<i64: 32, 16>}, {pipeline_mode = #tpu.pipeline_mode<synchronous>, transform_indices = @transform_3, window_bounds = array<i64: 32, 1>}, {pipeline_mode = #tpu.pipeline_mode<synchronous>, transform_indices = @transform_4, window_bounds = array<i64: 32, 32>}, {pipeline_mode = #tpu.pipeline_mode<synchronous>, transform_indices = @transform_5, window_bounds = array<i64: 32, 1>}, {pipeline_mode = #tpu.pipeline_mode<synchronous>, transform_indices = @transform_6, window_bounds = array<i64: 32, 48>}, {pipeline_mode = #tpu.pipeline_mode<synchronous>, transform_indices = @transform_7, window_bounds = array<i64: 1, 32>}, {pipeline_mode = #tpu.pipeline_mode<synchronous>, transform_indices = @transform_8, window_bounds = array<i64: 1, 1>}, {transform_indices = @transform_9, window_bounds = array<i64: 1, 128>}]} {
    %c0 = arith.constant 0 : index
    %c0_0 = arith.constant 0 : index
    %0 = vector.load %arg1[%c0, %c0_0] : memref<16x128xf32, #tpu.memory_space<vmem>>, vector<16x128xf32>
    %c0_1 = arith.constant 0 : index
    %c0_2 = arith.constant 0 : index
    %1 = vector.load %arg2[%c0_1, %c0_2] : memref<1x128xi32, #tpu.memory_space<vmem>>, vector<1x128xi32>
    %c0_3 = arith.constant 0 : index
    %c0_4 = arith.constant 0 : index
    %2 = vector.load %arg3[%c0_3, %c0_4] : memref<32x16xf32, #tpu.memory_space<vmem>>, vector<32x16xf32>
    %cst = arith.constant dense<0.000000e+00> : vector<32x128xf32>
    %3 = tpu.matmul %2, %0, %cst {dimension_numbers = #tpu.dot_dimension_numbers<[1], [0], [0], [1], [0, 0, 1, 1], [], []>} : vector<32x16xf32>, vector<16x128xf32>, vector<32x128xf32> -> vector<32x128xf32>
    %c0_5 = arith.constant 0 : index
    %c0_6 = arith.constant 0 : index
    %4 = vector.load %arg4[%c0_5, %c0_6] : memref<32x1xf32, #tpu.memory_space<vmem>>, vector<32x1xf32>
    %5 = vector.broadcast %4 : vector<32x1xf32> to vector<32x128xf32>
    %6 = arith.addf %3, %5 : vector<32x128xf32>
    %7 = math.tanh %6 : vector<32x128xf32>
    %c0_7 = arith.constant 0 : index
    %c0_8 = arith.constant 0 : index
    %8 = vector.load %arg5[%c0_7, %c0_8] : memref<32x32xf32, #tpu.memory_space<vmem>>, vector<32x32xf32>
    %cst_9 = arith.constant dense<0.000000e+00> : vector<32x128xf32>
    %9 = tpu.matmul %8, %7, %cst_9 {dimension_numbers = #tpu.dot_dimension_numbers<[1], [0], [0], [1], [0, 0, 1, 1], [], []>} : vector<32x32xf32>, vector<32x128xf32>, vector<32x128xf32> -> vector<32x128xf32>
    %c0_10 = arith.constant 0 : index
    %c0_11 = arith.constant 0 : index
    %10 = vector.load %arg6[%c0_10, %c0_11] : memref<32x1xf32, #tpu.memory_space<vmem>>, vector<32x1xf32>
    %11 = vector.broadcast %10 : vector<32x1xf32> to vector<32x128xf32>
    %12 = arith.addf %9, %11 : vector<32x128xf32>
    %13 = math.tanh %12 : vector<32x128xf32>
    %14 = tpu.iota {dimensions = array<i32: 0>} : vector<16x128xi32>
    %15 = vector.broadcast %1 : vector<1x128xi32> to vector<16x128xi32>
    %16 = arith.cmpi eq, %14, %15 : vector<16x128xi32>
    %17 = arith.extui %16 : vector<16x128xi1> to vector<16x128xi32>
    %18 = arith.sitofp %17 : vector<16x128xi32> to vector<16x128xf32>
    %19 = tpu.concatenate %18, %13 in 0 : vector<16x128xf32>, vector<32x128xf32> -> vector<48x128xf32>
    %c0_12 = arith.constant 0 : index
    %c0_13 = arith.constant 0 : index
    %20 = vector.load %arg7[%c0_12, %c0_13] : memref<32x48xf32, #tpu.memory_space<vmem>>, vector<32x48xf32>
    %cst_14 = arith.constant dense<0.000000e+00> : vector<32x128xf32>
    %21 = tpu.matmul %20, %19, %cst_14 {dimension_numbers = #tpu.dot_dimension_numbers<[1], [0], [0], [1], [0, 0, 1, 1], [], []>} : vector<32x48xf32>, vector<48x128xf32>, vector<32x128xf32> -> vector<32x128xf32>
    %22 = math.tanh %21 : vector<32x128xf32>
    %c0_15 = arith.constant 0 : index
    %c0_16 = arith.constant 0 : index
    %23 = vector.load %arg8[%c0_15, %c0_16] : memref<1x32xf32, #tpu.memory_space<vmem>>, vector<1x32xf32>
    %cst_17 = arith.constant dense<0.000000e+00> : vector<1x128xf32>
    %24 = tpu.matmul %23, %22, %cst_17 {dimension_numbers = #tpu.dot_dimension_numbers<[1], [0], [0], [1], [0, 0, 1, 1], [], []>} : vector<1x32xf32>, vector<32x128xf32>, vector<1x128xf32> -> vector<1x128xf32>
    %c0_18 = arith.constant 0 : index
    %c0_19 = arith.constant 0 : index
    %25 = vector.load %arg9[%c0_18, %c0_19] : memref<1x1xf32, #tpu.memory_space<vmem>>, vector<1x1xf32>
    %26 = vector.broadcast %25 : vector<1x1xf32> to vector<1x128xf32>
    %27 = arith.addf %24, %26 : vector<1x128xf32>
    %28 = arith.negf %27 : vector<1x128xf32>
    %29 = math.exp %28 : vector<1x128xf32>
    %cst_20 = arith.constant 1.000000e+00 : f32
    %30 = vector.broadcast %cst_20 : f32 to vector<1x128xf32>
    %31 = arith.addf %30, %29 : vector<1x128xf32>
    %32 = arith.divf %30, %31 : vector<1x128xf32>
    %c0_21 = arith.constant 0 : index
    %c0_22 = arith.constant 0 : index
    %33 = vector.load %arg10[%c0_21, %c0_22] : memref<1x128xf32, #tpu.memory_space<vmem>>, vector<1x128xf32>
    tpu.vector_store %arg10[%c0_21, %c0_22], %32 {strides = array<i32>} : memref<1x128xf32, #tpu.memory_space<vmem>>, vector<1x128xf32>,
    return
  }
  func.func @transform_0(%arg0: i32) -> (i32, i32) {
    %c0_i32 = arith.constant 0 : i32
    %c0_i32_0 = arith.constant 0 : i32
    return %c0_i32, %arg0 : i32, i32
  }
  func.func @transform_1(%arg0: i32) -> (i32, i32) {
    %c0_i32 = arith.constant 0 : i32
    %c0_i32_0 = arith.constant 0 : i32
    return %c0_i32, %arg0 : i32, i32
  }
  func.func @transform_2(%arg0: i32) -> (i32, i32) {
    %c0_i32 = arith.constant 0 : i32
    %c0_i32_0 = arith.constant 0 : i32
    %c0_i32_1 = arith.constant 0 : i32
    return %c0_i32, %c0_i32_0 : i32, i32
  }
  func.func @transform_3(%arg0: i32) -> (i32, i32) {
    %c0_i32 = arith.constant 0 : i32
    %c0_i32_0 = arith.constant 0 : i32
    %c0_i32_1 = arith.constant 0 : i32
    return %c0_i32, %c0_i32_0 : i32, i32
  }
  func.func @transform_4(%arg0: i32) -> (i32, i32) {
    %c0_i32 = arith.constant 0 : i32
    %c0_i32_0 = arith.constant 0 : i32
    %c0_i32_1 = arith.constant 0 : i32
    return %c0_i32, %c0_i32_0 : i32, i32
  }
  func.func @transform_5(%arg0: i32) -> (i32, i32) {
    %c0_i32 = arith.constant 0 : i32
    %c0_i32_0 = arith.constant 0 : i32
    %c0_i32_1 = arith.constant 0 : i32
    return %c0_i32, %c0_i32_0 : i32, i32
  }
  func.func @transform_6(%arg0: i32) -> (i32, i32) {
    %c0_i32 = arith.constant 0 : i32
    %c0_i32_0 = arith.constant 0 : i32
    %c0_i32_1 = arith.constant 0 : i32
    return %c0_i32, %c0_i32_0 : i32, i32
  }
  func.func @transform_7(%arg0: i32) -> (i32, i32) {
    %c0_i32 = arith.constant 0 : i32
    %c0_i32_0 = arith.constant 0 : i32
    %c0_i32_1 = arith.constant 0 : i32
    return %c0_i32, %c0_i32_0 : i32, i32
  }
  func.func @transform_8(%arg0: i32) -> (i32, i32) {
    %c0_i32 = arith.constant 0 : i32
    %c0_i32_0 = arith.constant 0 : i32
    %c0_i32_1 = arith.constant 0 : i32
    return %c0_i32, %c0_i32_0 : i32, i32
  }
  func.func @transform_9(%arg0: i32) -> (i32, i32) {
    %c0_i32 = arith.constant 0 : i32
    %c0_i32_0 = arith.constant 0 : i32
    return %c0_i32, %arg0 : i32, i32
  }
}

</mosaic_0001>

<bundles_post_ra>
// kernel: tpu_custom_call.1
= control target key start
LH: loop header
LB: loop body
LE: loop exit
PB: predicated region body
PF: predicated region fallthrough
CT: control target
= control target key end

     0   :  { %s874_s0 = inlined_call_operand.vmem [shape: f32[16,128], index: 0, kind: input, shape index: {}]   ;;  %s875_s1 = inlined_call_operand.vmem [shape: s32[1,128], index: 1, kind: input, shape index: {}]   ;;  %s876_s2 = inlined_call_operand.vmem [shape: f32[32,16], index: 2, kind: input, shape index: {}]   ;;  %s877_s3 = inlined_call_operand.vmem [shape: f32[32,1], index: 3, kind: input, shape index: {}]   ;;  %s878_s4 = inlined_call_operand.vmem [shape: f32[32,32], index: 4, kind: input, shape index: {}]   ;;  %s879_s5 = inlined_call_operand.vmem [shape: f32[32,1], index: 5, kind: input, shape index: {}]   ;;  %s880_s6 = inlined_call_operand.vmem [shape: f32[32,48], index: 6, kind: input, shape index: {}]   ;;  %s881_s7 = inlined_call_operand.vmem [shape: f32[1,32], index: 7, kind: input, shape index: {}]   ;;  %s882_s8 = inlined_call_operand.<no memory space> [shape: f32[1,1], index: 8, kind: input, shape index: {}]   ;;  %s883_s9 = inlined_call_operand.hbm [shape: f32[1,128], index: 9, kind: output, shape index: {}]  }
   0x1   :  { %v14_v0 = vstv %s882_s8 }
   0x2   :  { %15 = vst [vmem:[#allocation2] sm:$0x1] %v14_v0 }
   0x3   :  { %v35_v1 = vld [vmem:[%s874_s0] sm:$0xff]  ;;  %v36_v2 = vld [vmem:[%s874_s0 + $0x8] sm:$0xff]  ;;  %vm66_vm0 = vcmask 130048   ;;  %v713_v5 = vmov 0   ;;  %v44_v7 = vld [vmem:[%s877_s3 + $0x10] sm:$0xff] }
   0x4   :  { %v38_v3 = vld [vmem:[%s876_s2] sm:$0xff]  ;;  %v623_v4 = vpack.c.bf16 %v36_v2, %v35_v1  ;;  %659 = vset.pattern.permute.xlu0 %v713_v5  ;;  %660 = vset.pattern.permute.xlu1 %v713_v5  ;;  %v39_v8 = vld [vmem:[%s876_s2 + $0x8] sm:$0xff]  ;;  %v40_v10 = vld [vmem:[%s876_s2 + $0x10] sm:$0xff] }
   0x5   :  { %574 = vmatprep.mubr.msk.f32.mxu0 %vm66_vm0, %v38_v3  ;;  %v42_v6 = vld [vmem:[%s877_s3] sm:$0xff]  ;;  %v43_v9 = vld [vmem:[%s877_s3 + $0x8] sm:$0xff]  ;;  %58 = vperm.xlu1 %660, %v44_v7   ;;  %v45_v11 = vld [vmem:[%s877_s3 + $0x18] sm:$0xff] }
   0x6   :  { %624 = vmatprep.subr.bf16.mxu0 %v623_v4  ;;  %48 = vperm.xlu0 %659, %v42_v6  }
   0x7   :  { %626 = vmatpush3.bf16.msra.mxu0 %v623_v4 }
   0x8   :  { %16 = vsyncpa [#allocation4], 0  ;;  %v41_v12 = vld [vmem:[%s876_s2 + $0x18] sm:$0xff]  ;;  %v172_v13 = vld [vmem:[%s879_s5] sm:$0xff]  ;;  %vm196_vm1 = vcmask 261120   ;;  %v298_v40 = vlaneseq  ;;  %vm315_vm5 = vcmask 392192  }
   0x9   :  { %63 = vperm.xlu1 %660, %v45_v11   ;;  %v173_v14 = vld [vmem:[%s879_s5 + $0x8] sm:$0xff]  ;;  %v174_v15 = vld [vmem:[%s879_s5 + $0x10] sm:$0xff]  ;;  %v175_v16 = vld [vmem:[%s879_s5 + $0x18] sm:$0xff]  ;;  %v714_v44 = vmov 1.0|1.0   ;;  %v715_v3 = vmov 0.0|0.0  }
   0xa   :  { %575 = vmatmul.mubr.msk.f32.vlgmr.msra.gmra.mrb[0].mxu0 %vm66_vm0, %v39_v8  ;;  %53 = vperm.xlu0 %659, %v43_v9   ;;  %v418_v17 = vld [vmem:[#allocation2] sm:$0x1]  ;;  %v169_v37 = vld [vmem:[%s878_s4 + $0x8] sm:$0xff]  ;;  %v170_v38 = vld [vmem:[%s878_s4 + $0x10] sm:$0xff]  ;;  %v834_v41 = vshrl.u32 %v298_v40, 7  ;;  %vm716_vm6 = vmmov 0  }
   0xb   :  { %577 = vmatprep.mubr.msk.f32.mxu0 %vm66_vm0, %v40_v10  ;;  %v168_v18 = vld [vmem:[%s878_s4] sm:$0xff]  ;;  %v171_v39 = vld [vmem:[%s878_s4 + $0x18] sm:$0xff]  ;;  %v312_v0 = vld [vmem:[%s880_s6 + $0x8] sm:$0xff]  ;;  %v717_v4 = vmov 0.0   ;;  %s718_s28 = smov [#allocation3]  }
   0xc   :  { %588 = vmatprep.mubr.msk.f32.mxu1 %vm196_vm1, %v168_v18  ;;  %v530_v42 = vld [vmem:[%s875_s1] ss:$0 sm:$0xff]  ;;  %v300_v43 = vadd.s32 8, %v834_v41  ;;  %v313_v1 = vld [vmem:[%s880_s6 + $0x10] sm:$0xff]  ;;  %v314_v2 = vld [vmem:[%s880_s6 + $0x18] sm:$0xff]  ;;  %s514_s29 = sshll.u32 %s718_s28, 4  ;;  %s515_s29 = int_to_ptr.vmem [resolvable:$true] %s514_s29 }
   0xd   :  { %183 = vperm.xlu1 %660, %v173_v14   ;;  %vm305_vm2 = vcmp.eq.s32.totalorder %v834_v41, %v530_v42  ;;  %v311_v45 = vld [vmem:[%s880_s6] sm:$0xff]  ;;  %s693_s30 = scalar_lea.vmem %s515_s29, 32  ;;  %p694_p1 = scmp.lt.s32.totalorder %s515_s29, %s515_s29 }
   0xe   :  { %578 = vmatmul.mubr.msk.f32.gmra.mrb[2].mxu0 %vm66_vm0, %v41_v12  ;;  %178 = vperm.xlu0 %659, %v172_v13   ;;  %vm306_vm3 = vcmp.eq.s32.totalorder %v300_v43, %v530_v42 }
   0xf   :  { %vm635_vm4 = vmpackc.low %vm306_vm3, %vm305_vm2  ;;  %606 = vmatprep.mubr.msk.f32.mxu0 %vm315_vm5, %v311_v45 }
  0x10   :  { %636 = vmatprep.subr.msk.bf16.mxu0 %vm635_vm4, %v714_v44 }
  0x11   :  { %193 = vperm.xlu1 %660, %v175_v16   ;;  %638 = vmatpush3.bf16.msk.msra.mxu0 %vm635_vm4, %v714_v44  ;;  %v426_v16 = vsub.s32 0, %v834_v41 }
  0x12   :  { %188 = vperm.xlu0 %659, %v174_v15   ;;  %v417_v15 = vld [vmem:[%s881_s7] sm:$0x1]  ;;  %s689_s7 = scalar_lea.vmem %s515_s29, 16 }
  0x13   :  { %p690_p0 = scmp.ne.s32.totalorder %s515_s29, %s689_s7  ;;  %p695_p2 = scmp.lt.s32.totalorder %s693_s30, %s689_s7 }
  0x15   :  { %p696_p3 = por %p695_p2, %p694_p1 }
  0x16   :  { %421 = vperm.xlu0 %659, %v418_v17  }
  0x17   :  { %p697_p4 = pnand %p696_p3, %p690_p0 }
  0x84   :  { %v59_v20 = vpop.permute.xlu1 %58 }
  0x85   :  { %v49_v19 = vpop.permute.xlu0 %48 }
  0x88   :  { %v64_v26 = vpop.permute.xlu1 %63 }
  0x89   :  { %v54_v21 = vpop.permute.xlu0 %53 }
  0x8c   :  { %v184_v46 = vpop.permute.xlu1 %183 }
  0x8d   :  { %v179_v47 = vpop.permute.xlu0 %178 }
  0x90   :  { %v194_v52 = vpop.permute.xlu1 %193 }
  0x91   :  { %v189_v54 = vpop.permute.xlu0 %188 }
  0x95   :  { %v422_v17 = vpop.permute.xlu0 %421 }
  0x96   :  { %v427_v18 = vrot.slane %v422_v17, %v426_v16 }
  0xdd   :  { %v576_v22 = vpop.f32.mrb[0].mxu0 }
  0xde   :  { %v151_v23 = vadd.f32 %v576_v22, %v54_v21  ;;  %v145_v24 = vpop.f32.mrb[1].mxu0 }
  0xdf   :  { %v146_v25 = vadd.f32 %v145_v24, %v49_v19 }
  0xe0   :  { %661 = vtanh.f32 %v151_v23 }
  0xe1   :  { %663 = vtanh.f32 %v146_v25  ;;  %v579_v27 = vpop.f32.mrb[2].mxu0 }
  0xe2   :  { %v161_v28 = vadd.f32 %v579_v27, %v64_v26  ;;  %v155_v29 = vpop.f32.mrb[3].mxu0 }
  0xe3   :  { %v156_v30 = vadd.f32 %v155_v29, %v59_v20 }
  0xe4   :  { %665 = vtanh.f32 %v161_v28 }
  0xe5   :  { %667 = vtanh.f32 %v156_v30 }
  0xea   :  { %v662_v31 = vpop.eup %661 }
  0xeb   :  { %v664_v32 = vpop.eup %663 }
  0xec   :  { %v627_v33 = vpack.c.bf16 %v662_v31, %v664_v32 }
  0xee   :  { %v666_v34 = vpop.eup %665  ;;  %628 = vmatprep.subr.bf16.mxu1 %v627_v33 }
  0xef   :  { %v668_v35 = vpop.eup %667  ;;  %630 = vmatpush3.bf16.msra.mxu1 %v627_v33 }
  0xf0   :  { %v631_v36 = vpack.c.bf16 %v666_v34, %v668_v35 }
  0xf2   :  { %632 = vmatprep.subr.bf16.mxu1 %v631_v36 }
  0xf3   :  { %634 = vmatpush3.bf16.msra.mxu1 %v631_v36 }
  0xf4   :  { %647 = vmatprep.subr.bf16.mxu1 %v715_v3 }
  0xf6   :  { %589 = vmatmul.mubr.msk.f32.vlgmr.msra.gmra.mrb[0].mxu1 %vm196_vm1, %v169_v37 }
  0xf7   :  { %591 = vmatprep.mubr.msk.f32.mxu1 %vm196_vm1, %v170_v38 }
  0xfa   :  { %592 = vmatmul.mubr.msk.f32.gmra.mrb[2].mxu1 %vm196_vm1, %v171_v39 }
  0xfb   :  { %620 = vmatprep.mubr.msk.f32.mxu1 %vm716_vm6, %v717_v4 }
 0x1c9   :  { %v590_v48 = vpop.f32.mrb[0].mxu1 }
 0x1ca   :  { %v281_v49 = vadd.f32 %v590_v48, %v184_v46  ;;  %v275_v50 = vpop.f32.mrb[1].mxu1 }
 0x1cb   :  { %v276_v51 = vadd.f32 %v275_v50, %v179_v47 }
 0x1cc   :  { %669 = vtanh.f32 %v281_v49 }
 0x1cd   :  { %671 = vtanh.f32 %v276_v51  ;;  %v593_v53 = vpop.f32.mrb[2].mxu1 }
 0x1ce   :  { %v291_v55 = vadd.f32 %v593_v53, %v194_v52  ;;  %v285_v56 = vpop.f32.mrb[3].mxu1 }
 0x1cf   :  { %v286_v57 = vadd.f32 %v285_v56, %v189_v54 }
 0x1d0   :  { %673 = vtanh.f32 %v291_v55 }
 0x1d1   :  { %675 = vtanh.f32 %v286_v57 }
 0x1d6   :  { %v670_v58 = vpop.eup %669 }
 0x1d7   :  { %v672_v59 = vpop.eup %671 }
 0x1d8   :  { %v639_v60 = vpack.c.bf16 %v670_v58, %v672_v59 }
 0x1da   :  { %v674_v61 = vpop.eup %673  ;;  %640 = vmatprep.subr.bf16.mxu0 %v639_v60 }
 0x1db   :  { %v676_v62 = vpop.eup %675  ;;  %642 = vmatpush3.bf16.msra.mxu0 %v639_v60 }
 0x1dc   :  { %v643_v63 = vpack.c.bf16 %v674_v61, %v676_v62 }
 0x1de   :  { %644 = vmatprep.subr.bf16.mxu0 %v643_v63 }
 0x1df   :  { %646 = vmatpush3.bf16.msra.mxu0 %v643_v63 }
 0x1e2   :  { %607 = vmatmul.mubr.msk.f32.vlgmr.msra.gmra.mrb[4].mxu0 %vm315_vm5, %v312_v0 }
 0x1e3   :  { %609 = vmatprep.mubr.msk.f32.mxu0 %vm315_vm5, %v313_v1 }
 0x1e6   :  { %610 = vmatmul.mubr.msk.f32.gmra.mrb[6].mxu0 %vm315_vm5, %v314_v2 }
 0x2b5   :  { %v608_v5 = vpop.f32.mrb[4].mxu0 }
 0x2b6   :  { %677 = vtanh.f32 %v608_v5  ;;  %v394_v6 = vpop.f32.mrb[5].mxu0 }
 0x2b7   :  { %679 = vtanh.f32 %v394_v6 }
 0x2b9   :  { %v611_v7 = vpop.f32.mrb[6].mxu0 }
 0x2ba   :  { %681 = vtanh.f32 %v611_v7  ;;  %v404_v8 = vpop.f32.mrb[7].mxu0 }
 0x2bb   :  { %683 = vtanh.f32 %v404_v8 }
 0x2c0   :  { %v678_v9 = vpop.eup %677 }
 0x2c1   :  { %v680_v10 = vpop.eup %679 }
 0x2c2   :  { %v648_v11 = vpack.c.bf16 %v678_v9, %v680_v10 }
 0x2c4   :  { %v682_v12 = vpop.eup %681  ;;  %649 = vmatpush3.bf16.msra.mxu1 %v648_v11 }
 0x2c5   :  { %v684_v13 = vpop.eup %683  ;;  %650 = vmatprep.subr.bf16.mxu1 %v715_v3 }
 0x2c6   :  { %v651_v14 = vpack.c.bf16 %v682_v12, %v684_v13 }
 0x2c8   :  { %652 = vmatpush3.bf16.msra.mxu1 %v651_v14 }
 0x2cb   :  { %621 = vmatmul.mubr.msk.f32.vlgmr.msra.gmra.mrb[4].mxu1 %vm196_vm1, %v417_v15 }
 0x39e   :  { %v497_v19 = vpop.f32.mrb[4].mxu1 }
 0x39f   :  { %v498_v20 = vadd.f32 %v497_v19, %v427_v18  ;;  %v622_v21 = vpop.f32.mrb[5].mxu1 }
 0x3a1   :  { %v540_v22 = vmul.f32 -1.442695, %v498_v20 }
 0x3a3   :  { %685 = vpow2.f32 %v540_v22 }
 0x3ad   :  { %v686_v23 = vpop.eup %685 }
 0x3ae   :  { %v504_v24 = vadd.f32 1.0, %v686_v23 }
 0x3b0   :  { %687 = vrcp.f32 %v504_v24 }
 0x3ba   :  { %v688_v25 = vpop.eup %687 }
 0x3bb   :  { %507 = vst [vmem:[#allocation3] sm:$0x1] %v688_v25 }
 0x3bc   :  { %700 = shalt.err (!%p697_p4)
}
 0x3bd   :  { %s701_s3 = scalar_lea.hbm %s883_s9, 16 }
 0x3be   :  { %p702_p5 = scmp.ne.s32.totalorder %s883_s9, %s701_s3  ;;  %p705_p6 = scmp.lt.u32.totalorder %s701_s3, %s883_s9 }
 0x3c0   :  { %p707_p7 = pnand %p705_p6, %p702_p5 }
 0x3c2   :  { %710 = shalt.err (!%p707_p7)
}
 0x3c3   :  { %517 = dma.vmem_to_hbm [thread:$0]  %s515_s29, 16, %s883_s9, [#allocation4]  }
 0x3c4   :  { %711 = dma.done.wait [#allocation4], 16  }
 0x3c5   :  { %712 = vsyncadd [#allocation4], 4294967280 }
 0x3c6   :  { %521 = vsyncpa [#allocation4], 1 }

</bundles_post_ra>
